<compile_context>
chip_gen: v6e
topology: v6e:2x2x1
jax: 0.10.0
libtpu: 0.0.40
codegen_flags: <defaults>
</compile_context>

<pallas_src>
import functools

import jax
import jax.numpy as jnp
from jax import lax
from jax.experimental import pallas as pl
from jax.experimental.pallas import tpu as pltpu


def _embed_kernel(ids_ref, tok_tbl_ref, pos_ref, out_ref, *, vocab_chunk, num_chunks):
    # ids_ref:     (tile_s, 1) int32 token ids for this (seq-tile, batch) grid step.
    # tok_tbl_ref: (V, D) float32 token-embedding table, VMEM-resident (single copy).
    # pos_ref:     (tile_s, D) float32 positional rows for this sequence tile.
    # out_ref:     (tile_s, D) output tile (leading batch dim squeezed by the BlockSpec).
    ids = ids_ref[...]                                            # (tile_s, 1) int32
    tile_s = ids.shape[0]
    lane = lax.broadcasted_iota(jnp.int32, (tile_s, vocab_chunk), 1)

    def add_chunk(c, acc):
        start = pl.multiple_of(c * vocab_chunk, vocab_chunk)
        tbl = tok_tbl_ref[pl.ds(start, vocab_chunk), :]           # (vc, D) VMEM-local read
        hot = (ids == lane + start).astype(jnp.float32)           # (tile_s, vc) exact 0/1
        # One-hot x table on the MXU; HIGHEST precision keeps the f32 row selection exact.
        return acc + jnp.dot(hot, tbl,
                             preferred_element_type=jnp.float32,
                             precision=jax.lax.Precision.HIGHEST)

    acc0 = pos_ref[...].astype(jnp.float32)                       # start from the positional part
    res = lax.fori_loop(0, num_chunks, add_chunk, acc0, unroll=num_chunks <= 8)
    out_ref[...] = res.astype(out_ref.dtype)                      # single dense (tile_s, D) store
    # Dropout: eval-mode identity (see TODO above).


def _pick_seq_tile(seq_len, fixed_bytes, per_row_bytes, budget_bytes):
    """Largest multiple-of-8 divisor of seq_len (<=512) whose working set fits the budget."""
    cands = [c for c in (512, 256, 128, 64, 32, 16, 8)
             if c <= seq_len and seq_len % c == 0]
    if not cands:
        cands = [seq_len]           # block == full dim is always a legal block shape
    for cand in cands:
        if fixed_bytes + cand * per_row_bytes <= budget_bytes:
            return cand
    return cands[-1]


def input_embedding_forward(token_ids, tok_table, pos_table):
    """token_ids: (B, S) int; tok_table/pos_table: (V, D) float32 -> (B, S, D) float32."""
    B, S = token_ids.shape
    V, D = tok_table.shape
    Vp, Dp = pos_table.shape
    assert Dp == D, "embedding widths must match"
    assert S <= Vp, "sequence length exceeds positional-embedding table rows"

    # Generation-aware VMEM budget: ~3/4 of physical VMEM (v5e/v6e 128 MiB -> 96 MiB,
    # v7x 64 MiB -> 48 MiB).  Conservative fallback if the query is unavailable.
    try:
        vmem_cap = int(pltpu.get_tpu_info().vmem_capacity_bytes)
    except Exception:
        vmem_cap = 64 * 1024 * 1024
    vmem_limit = (vmem_cap // 4) * 3

    itemsize = tok_table.dtype.itemsize
    table_bytes = V * D * itemsize          # single-buffered: memory_space=VMEM, not pipelined

    # Vocab chunk for the in-kernel one-hot matmul (bounds the (tile_s, vc) one-hot temp).
    vocab_chunk = V
    if V > 1024:
        for cand in (1024, 512, 256, 128):
            if V % cand == 0:
                vocab_chunk = cand
                break
    num_chunks = V // vocab_chunk           # == 1 when vocab_chunk == V

    # Budget-aware seq tile: resident table + double-buffered pos/out/id blocks + in-kernel
    # one-hot and accumulator temporaries must fit the per-generation VMEM budget.
    per_row_bytes = (
        2 * D * itemsize        # pos block (double-buffered)
        + 2 * D * itemsize      # out block (double-buffered)
        + 2 * 128 * 4           # ids block, lane-padded int32 (double-buffered)
        + vocab_chunk * 4       # one-hot temporary
        + 2 * D * 4             # f32 accumulator / result temporaries
    )
    slack = 2 * 1024 * 1024
    tile_s = _pick_seq_tile(S, table_bytes + slack, per_row_bytes, vmem_limit)
    assert table_bytes + slack + tile_s * per_row_bytes <= vmem_limit, (
        "token table too large for the VMEM-resident path on this TPU generation; "
        "see TODO(synk) about the manual DMA row-gather path")

    num_s_tiles = S // tile_s
    ids3 = token_ids.astype(jnp.int32).reshape(B, S, 1)

    # Corner case only (tile_s == S and not a multiple of 8): slice pos so the block spans the
    # full first dim and stays a legal block shape.  Normal path passes pos_table untouched.
    pos_in = pos_table
    if tile_s % 8 != 0 and tile_s != Vp:
        pos_in = pos_table[:S]

    kernel = functools.partial(_embed_kernel, vocab_chunk=vocab_chunk, num_chunks=num_chunks)

    grid_spec = pltpu.PrefetchScalarGridSpec(
        num_scalar_prefetch=0,
        grid=(num_s_tiles, B),              # batch innermost: pos block DMA reused across B
        in_specs=[
            # Token ids: tiny (tile_s, 1) VMEM block per step (no SMEM usage at all).
            pl.BlockSpec((pl.Squeezed(), tile_s, 1), lambda st, b: (b, st, 0)),
            # Token table: whole array resident in VMEM, single-buffered (not pipelined).
            pl.BlockSpec(memory_space=pltpu.MemorySpace.VMEM),
            # Positional rows: one contiguous (tile_s, D) block per sequence tile.
            pl.BlockSpec((tile_s, D), lambda st, b: (st, 0)),
        ],
        out_specs=pl.BlockSpec((pl.Squeezed(), tile_s, D), lambda st, b: (b, st, 0)),
    )

    return pl.pallas_call(
        kernel,
        out_shape=jax.ShapeDtypeStruct((B, S, D), tok_table.dtype),
        grid_spec=grid_spec,
        compiler_params=pltpu.CompilerParams(
            # Grid axis 0 (seq tiles) is what megacore shards; batch stays innermost per core,
            # so the pos-block reuse across B holds on v7x's 2 TensorCores as well.
            dimension_semantics=("parallel", "parallel"),
            vmem_limit_bytes=int(vmem_limit),
        ),
    )(ids3, tok_table, pos_in)


if __name__ == "__main__":
    # Small shapes consistent with the module (embed_len=64 from the spec).
    B, S = 2, 8
    vocab_size = 128
    embed_len = 64

    key = jax.random.PRNGKey(0)
    k_ids, k_tok, k_pos = jax.random.split(key, 3)

    token_ids = jax.random.randint(k_ids, (B, S), 0, vocab_size, dtype=jnp.int32)
    # nn.Embedding default init: N(0, 1)
    tok_table = jax.random.normal(k_tok, (vocab_size, embed_len), dtype=jnp.float32)
    pos_table = jax.random.normal(k_pos, (vocab_size, embed_len), dtype=jnp.float32)

    out = input_embedding_forward(token_ids, tok_table, pos_table)
    out = jax.block_until_ready(out)

    # Reference (same semantics as the PyTorch forward in eval mode).
    ref = tok_table[token_ids] + pos_table[jnp.arange(S)][None, :, :]
    assert out.shape == (B, S, embed_len)
    assert jnp.allclose(out, ref, atol=1e-4, rtol=1e-4), "mismatch vs reference"

    print("KERNEL_OK")
</pallas_src>

<mosaic_0001>
module attributes {stable_mosaic.version = 11 : i64} {
  func.func @_embed_kernel(%arg0: i32, %arg1: i32, %arg2: memref<1x8x1xi32, #tpu.memory_space<vmem>>, %arg3: memref<128x64xf32, #tpu.memory_space<vmem>>, %arg4: memref<8x64xf32, #tpu.memory_space<vmem>>, %arg5: memref<1x8x64xf32, #tpu.memory_space<vmem>>) attributes {dimension_semantics = [#tpu.dimension_semantics<parallel>, #tpu.dimension_semantics<parallel>], iteration_bounds = array<i64: 1, 2>, scalar_prefetch = 0 : i64, scratch_operands = 0 : i64, tpu.core_type = #tpu.core_type<tc>, window_params = [{transform_indices = @transform_0, window_bounds = array<i64: 1, 8, 1>}, {pipeline_mode = #tpu.pipeline_mode<synchronous>, transform_indices = @transform_1, window_bounds = array<i64: 128, 64>}, {transform_indices = @transform_2, window_bounds = array<i64: 8, 64>}, {transform_indices = @transform_3, window_bounds = array<i64: 1, 8, 64>}]} {
    %c0 = arith.constant 0 : index
    %c0_0 = arith.constant 0 : index
    %c0_1 = arith.constant 0 : index
    %0 = vector.load %arg2[%c0, %c0_0, %c0_1] : memref<1x8x1xi32, #tpu.memory_space<vmem>>, vector<1x8x1xi32>
    %1 = vector.shape_cast %0 : vector<1x8x1xi32> to vector<8x1xi32>
    %2 = tpu.iota {dimensions = array<i32: 1>} : vector<8x128xi32>
    %c0_2 = arith.constant 0 : index
    %c0_3 = arith.constant 0 : index
    %3 = vector.load %arg4[%c0_2, %c0_3] : memref<8x64xf32, #tpu.memory_space<vmem>>, vector<8x64xf32>
    %c0_i32 = arith.constant 0 : i32
    %c128_i32 = arith.constant 128 : i32
    %4 = arith.muli %c0_i32, %c128_i32 : i32
    %5 = tpu.assume_multiple %4, 128 : i32
    %6 = arith.index_cast %5 : i32 to index
    %c0_4 = arith.constant 0 : index
    %7 = vector.load %arg3[%6, %c0_4] : memref<128x64xf32, #tpu.memory_space<vmem>>, vector<128x64xf32>
    %8 = vector.broadcast %5 : i32 to vector<8x128xi32>
    %9 = arith.addi %2, %8 : vector<8x128xi32>
    %10 = vector.broadcast %1 : vector<8x1xi32> to vector<8x128xi32>
    %11 = arith.cmpi eq, %10, %9 : vector<8x128xi32>
    %12 = arith.extui %11 : vector<8x128xi1> to vector<8x128xi32>
    %13 = arith.sitofp %12 : vector<8x128xi32> to vector<8x128xf32>
    %cst = arith.constant dense<0.000000e+00> : vector<8x64xf32>
    %14 = tpu.matmul %13, %7, %cst {dimension_numbers = #tpu.dot_dimension_numbers<[1], [0], [0], [1], [0, 0, 1, 1], [], []>, precision = #tpu.contract_precision<fp32>} : vector<8x128xf32>, vector<128x64xf32>, vector<8x64xf32> -> vector<8x64xf32>
    %15 = arith.addf %3, %14 : vector<8x64xf32>
    %c1_i32 = arith.constant 1 : i32
    %c0_5 = arith.constant 0 : index
    %c0_6 = arith.constant 0 : index
    %c0_7 = arith.constant 0 : index
    %16 = vector.load %arg5[%c0_5, %c0_6, %c0_7] : memref<1x8x64xf32, #tpu.memory_space<vmem>>, vector<1x8x64xf32>
    %17 = vector.shape_cast %16 : vector<1x8x64xf32> to vector<8x64xf32>
    %18 = vector.shape_cast %15 : vector<8x64xf32> to vector<1x8x64xf32>
    tpu.vector_store %arg5[%c0_5, %c0_6, %c0_7], %18 {strides = array<i32>} : memref<1x8x64xf32, #tpu.memory_space<vmem>>, vector<1x8x64xf32>,
    return
  }
  func.func @transform_0(%arg0: i32, %arg1: i32) -> (i32, i32, i32) {
    %c0_i32 = arith.constant 0 : i32
    %c0_i32_0 = arith.constant 0 : i32
    return %arg1, %arg0, %c0_i32 : i32, i32, i32
  }
  func.func @transform_1(%arg0: i32, %arg1: i32) -> (i32, i32) {
    %c0_i32 = arith.constant 0 : i32
    %c0_i32_0 = arith.constant 0 : i32
    %c0_i32_1 = arith.constant 0 : i32
    return %c0_i32, %c0_i32_0 : i32, i32
  }
  func.func @transform_2(%arg0: i32, %arg1: i32) -> (i32, i32) {
    %c0_i32 = arith.constant 0 : i32
    %c0_i32_0 = arith.constant 0 : i32
    return %arg0, %c0_i32 : i32, i32
  }
  func.func @transform_3(%arg0: i32, %arg1: i32) -> (i32, i32, i32) {
    %c0_i32 = arith.constant 0 : i32
    %c0_i32_0 = arith.constant 0 : i32
    return %arg1, %arg0, %c0_i32 : i32, i32, i32
  }
}

</mosaic_0001>

<bundles_post_ra>
// kernel: tpu_custom_call.1
= control target key start
LH: loop header
LB: loop body
LE: loop exit
PB: predicated region body
PF: predicated region fallthrough
CT: control target
= control target key end

     0   :  { %8 = vsyncpa [#allocation3], 0  ;;  %s1999_s0 = inlined_call_operand.vmem [shape: s32[2,8,1], index: 0, kind: input, shape index: {}]   ;;  %s2000_s1 = inlined_call_operand.vmem [shape: f32[128,64], index: 1, kind: input, shape index: {}]   ;;  %s2001_s2 = inlined_call_operand.vmem [shape: f32[128,64], index: 2, kind: input, shape index: {}]   ;;  %s2002_s3 = inlined_call_operand.hbm [shape: f32[2,8,64], index: 3, kind: output, shape index: {}]  }
   0x1   :  { %10 = vsyncpa [#allocation3 + $0x1], 0  ;;  %s1472_s12 = smov 0   ;;  %s1474_s13 = smov 0  }
   0x2   :  { %s1476_s14 = smov 0   ;;  %s1478_s15 = smov 0  }
   0x3   :  { %s1480_s16 = smov 0   ;;  %s1482_s17 = smov 0  }
   0x4 LB: > { %s981_s18 = sadd.s32 4294967295, %s1445_s17   ;;  %s982_s19 = sadd.s32 4294967294, %s1445_s17   ;;  %s1445_s17 = sphi %s1482_s17, %s16_s17   ;;  %s1441_s16 = sphi %s1480_s16, %s2009_s16   ;;  %s1437_s15 = sphi %s1478_s15, %s2008_s15   ;;  %s1433_s14 = sphi %s1476_s14, %s2007_s14   ;;  %s1429_s13 = sphi %s1474_s13, %s2006_s13   ;;  %s1425_s12 = sphi %s1472_s12, %s2005_s12  }
   0x5   : > { %s25_s20 = sadd.s32 1, %s1441_s16  ;;  %s112_s21 = sadd.s32 1, %s1433_s14 }
   0x6   : > { %p26_p0 = scmp.ge.s32.totalorder %s25_s20, 2  ;;  %p122_p1 = scmp.ne.s32.totalorder %s1433_s14, %s1429_s13 }
   0x7   : > { %p123_p2 = scmp.eq.s32.totalorder %s981_s18, 1  ;;  %p128_p3 = scmp.ne.s32.totalorder %s1429_s13, %s1425_s12 }
   0x8   : > { %s2011_s20 = smov (%p26_p0, %s25_s20), 0  ;;  %p129_p5 = scmp.eq.s32.totalorder %s982_s19, 1 }
   0x9   : > { %p1512_p4 = por %p123_p2, %p122_p1  ;;  %s107_s23 = ssub.s32 %s1441_s16, %s2011_s20 }
   0xa   : > { %p986_p6 = scmp.ge.s32.totalorder %s1445_s17, 1  ;;  %p110_p7 = scmp.eq.s32.totalorder %s107_s23, 0 }
   0xb   : > { %p1519_p8 = por %p129_p5, %p128_p3  ;;  %p167_p9 = scmp.lt.s32.totalorder %s1445_s17, 3 }
   0xc   : > { %s1525_s25 = scalar_select %p110_p7, %s1433_s14, %s112_s21  }
   0xd   : > { %p168_p10 = pnand %p986_p6, %p167_p9 }
   0xe   : > { %p197_p11 = scmp.lt.s32.totalorder (!%p168_p10), %s1437_s15, 1  ;;  %s994_s6 = sshll.u32 (!%p168_p10), %s1437_s15, 7 }
   0xf   : > { %171 = sbr.rel (%p168_p10) target bundleno = 437 (0x1b5), region = 32  ;;  %s1451_s21 = smov (!%p168_p10), [#allocation2]  }
  0x10   : > { %s1373_s23 = sshll.u32 (!%p168_p10), %s1451_s21, 4  ;;  %s1374_s23 = int_to_ptr.vmem [resolvable:$false] %s1373_s23 }
  0x14   : > { %v227_v0 = vld [vmem:[%s2000_s1 + $0x78] sm:$0xff]  ;;  %v226_v1 = vld [vmem:[%s2000_s1 + $0x70] sm:$0xff]  ;;  %v225_v2 = vld [vmem:[%s2000_s1 + $0x68] sm:$0xff]  ;;  %v1447_v3 = vmov 0   ;;  %v1448_v4 = vmov 0.0   ;;  %s198_s11 = scalar_select %p197_p11, %s1437_s15, 1 }
  0x15   : > { %1368 = vset.pattern.permute.xlu0 %v1447_v3  ;;  %1134 = vmatprep.subr.mxu1 %v1448_v4  ;;  %v1538_v5 = vand.u32 4294901760, %v227_v0  ;;  %v1540_v6 = vand.u32 4294901760, %v226_v1  ;;  %v1542_v7 = vand.u32 4294901760, %v225_v2  ;;  %v224_v8 = vld [vmem:[%s2000_s1 + $0x60] sm:$0xff]  ;;  %v223_v9 = vld [vmem:[%s2000_s1 + $0x58] sm:$0xff]  ;;  %v222_v10 = vld [vmem:[%s2000_s1 + $0x50] sm:$0xff] }
  0x16   : > { %v1556_v11 = vand.u32 4294901760, %v224_v8  ;;  %1099 = vmatprep.subr.mxu0 %v1448_v4  ;;  %v1559_v12 = vand.u32 4294901760, %v223_v9  ;;  %v1561_v13 = vand.u32 4294901760, %v222_v10  ;;  %v221_v14 = vld [vmem:[%s2000_s1 + $0x48] sm:$0xff]  ;;  %v220_v15 = vld [vmem:[%s2000_s1 + $0x40] sm:$0xff]  ;;  %s988_s26 = sshll.u32 %s198_s11, 3  ;;  %s893_s11 = scalar_lea.hbm %s2002_s3, %s994_s6 }
  0x17   : > { %v1570_v16 = vsub.f32 %v227_v0, %v1538_v5  ;;  %v1573_v17 = vsub.f32 %v226_v1, %v1540_v6  ;;  %v1576_v18 = vsub.f32 %v225_v2, %v1542_v7  ;;  %1100 = vmatpush3.msra.mxu0 %v1538_v5  ;;  %v1579_v19 = vand.u32 4294901760, %v221_v14  ;;  %s203_s29 = scalar_lea.vmem %s1999_s0, %s988_s26  ;;  %v219_v36 = vld [vmem:[%s2000_s1 + $0x38] sm:$0xff]  ;;  %v218_v37 = vld [vmem:[%s2000_s1 + $0x30] sm:$0xff]  ;;  %v217_v38 = vld [vmem:[%s2000_s1 + $0x28] sm:$0xff]  ;;  %s1375_s15 = scalar_lea.vmem %s1374_s23, 256 }
  0x18   : > { %v1582_v20 = vsub.f32 %v224_v8, %v1556_v11  ;;  %v1585_v21 = vsub.f32 %v223_v9, %v1559_v12  ;;  %1101 = vmatprep.subr.mxu0 %v1448_v4  ;;  %v1589_v22 = vsub.f32 %v222_v10, %v1561_v13  ;;  %v1591_v23 = vand.u32 4294901760, %v220_v15  ;;  %v208_v27 = vld [vmem:[%s203_s29] sm:$0xff]  ;;  %v215_v51 = vld [vmem:[%s2000_s1 + $0x18] sm:$0xff]  ;;  %v214_v57 = vld [vmem:[%s2000_s1 + $0x10] sm:$0xff]  ;;  %s194_s29 = sand.u32 1, %s1429_s13  }
  0x19   : > { %v330_v24 = vand.u32 4294901760, %v1570_v16  ;;  %v337_v25 = vand.u32 4294901760, %v1573_v17  ;;  %v344_v26 = vand.u32 4294901760, %v1576_v18  ;;  %1102 = vmatpush3.msra.mxu0 %v1540_v6  ;;  %v1604_v30 = vsub.f32 %v221_v14, %v1579_v19  ;;  %231 = vperm.xlu0 %1368, %v208_v27   ;;  %v216_v44 = vld [vmem:[%s2000_s1 + $0x20] sm:$0xff]  ;;  %v213_v62 = vld [vmem:[%s2000_s1 + $0x8] sm:$0xff]  ;;  %s987_s30 = sshll.u32 %s194_s29, 3 }
  0x1a   : > { %v351_v28 = vand.u32 4294901760, %v1582_v20  ;;  %v358_v29 = vand.u32 4294901760, %v1585_v21  ;;  %1103 = vmatprep.subr.mxu0 %v1448_v4  ;;  %v365_v34 = vand.u32 4294901760, %v1589_v22  ;;  %v1619_v35 = vsub.f32 %v220_v15, %v1591_v23  ;;  %v212_v9 = vld [vmem:[%s2000_s1] sm:$0xff]  ;;  %s196_s7 = scalar_lea.vmem [#allocation2], %s987_s30  ;;  %s881_s18 = scalar_lea.sflag [#allocation3], %s194_s29 }
  0x1b   : > { %v331_v31 = vsub.f32 %v1570_v16, %v330_v24  ;;  %v338_v32 = vsub.f32 %v1573_v17, %v337_v25  ;;  %v345_v33 = vsub.f32 %v1576_v18, %v344_v26  ;;  %1104 = vmatpush3.msra.mxu0 %v1542_v7  ;;  %v372_v43 = vand.u32 4294901760, %v1604_v30  ;;  %s895_s8 = sshll.u32 %s196_s7, 4  ;;  %s896_s8 = int_to_ptr.vmem [resolvable:$true] %s895_s8 }
  0x1c   : > { %1105 = vmatprep.subr.mxu0 %v1448_v4  ;;  %v352_v41 = vsub.f32 %v1582_v20, %v351_v28  ;;  %v359_v42 = vsub.f32 %v1585_v21, %v358_v29  ;;  %v1642_v46 = vand.u32 4294901760, %v219_v36  ;;  %v1645_v47 = vand.u32 4294901760, %v218_v37  ;;  %s1369_s19 = scalar_lea.vmem %s896_s8, 128  ;;  %p1376_p1 = scmp.lt.s32.totalorder %s896_s8, %s1374_s23 }
  0x1d   : > { %v332_v39 = vand.u32 4294901760, %v331_v31  ;;  %v339_v40 = vand.u32 4294901760, %v338_v32  ;;  %1106 = vmatpush3.msra.mxu0 %v1556_v11  ;;  %v346_v45 = vand.u32 4294901760, %v345_v33  ;;  %v1647_v48 = vand.u32 4294901760, %v217_v38  ;;  %p1370_p12 = scmp.ne.s32.totalorder %s896_s8, %s1369_s19  ;;  %p1377_p2 = scmp.lt.s32.totalorder %s1375_s15, %s1369_s19 }
  0x1e   : > { %1107 = vmatprep.subr.mxu0 %v1448_v4  ;;  %v366_v49 = vsub.f32 %v1589_v22, %v365_v34  ;;  %v379_v50 = vand.u32 4294901760, %v1619_v35  ;;  %v353_v52 = vand.u32 4294901760, %v352_v41  ;;  %v1659_v53 = vsub.f32 %v219_v36, %v1642_v46 }
  0x1f   : > { %1135 = vmatpush3.msra.mxu1 %v332_v39  ;;  %1108 = vmatpush3.msra.mxu0 %v1559_v12  ;;  %v1662_v54 = vsub.f32 %v218_v37, %v1645_v47  ;;  %v1665_v55 = vand.u32 4294901760, %v216_v44  ;;  %v373_v56 = vsub.f32 %v1604_v30, %v372_v43  ;;  %v360_v58 = vand.u32 4294901760, %v359_v42  ;;  %p1371_p13 = pnand %p1370_p12, %p1512_p4  ;;  %p1378_p3 = por %p1377_p2, %p1376_p1 }
  0x20   : > { %1136 = vmatprep.subr.mxu1 %v1448_v4  ;;  %1109 = vmatprep.subr.mxu0 %v1448_v4  ;;  %v386_v59 = vand.u32 4294901760, %v1659_v53  ;;  %v1677_v60 = vsub.f32 %v217_v38, %v1647_v48  ;;  %v1680_v61 = vand.u32 4294901760, %v215_v51  ;;  %v380_v63 = vsub.f32 %v1619_v35, %v379_v50 }
  0x21   : > { %1137 = vmatpush3.msra.mxu1 %v339_v40  ;;  %1110 = vmatpush3.msra.mxu0 %v1561_v13  ;;  %v367_v0 = vand.u32 4294901760, %v366_v49  ;;  %v393_v1 = vand.u32 4294901760, %v1662_v54  ;;  %v1692_v2 = vsub.f32 %v216_v44, %v1665_v55  ;;  %v1695_v3 = vand.u32 4294901760, %v214_v57  ;;  %p1372_p0 = pneg %p1371_p13 }
  0x22   : > { %1138 = vmatprep.subr.mxu1 %v1448_v4  ;;  %1111 = vmatprep.subr.mxu0 %v1448_v4  ;;  %v1699_v8 = vand.u32 4294901760, %v213_v62  ;;  %v374_v10 = vand.u32 4294901760, %v373_v56  ;;  %v387_v14 = vsub.f32 %v1659_v53, %v386_v59  ;;  %v400_v15 = vand.u32 4294901760, %v1677_v60 }
  0x23   : > { %1139 = vmatpush3.msra.mxu1 %v346_v45  ;;  %1112 = vmatpush3.msra.mxu0 %v1579_v19  ;;  %v1709_v27 = vsub.f32 %v215_v51, %v1680_v61  ;;  %v381_v31 = vand.u32 4294901760, %v380_v63  ;;  %v394_v32 = vsub.f32 %v1662_v54, %v393_v1  ;;  %v407_v33 = vand.u32 4294901760, %v1692_v2  ;;  %p1379_p5 = pnand %p1378_p3, %p1372_p0 }
  0x24   : > { %1140 = vmatprep.subr.mxu1 %v1448_v4  ;;  %1113 = vmatprep.subr.mxu0 %v1448_v4  ;;  %v1719_v36 = vsub.f32 %v214_v57, %v1695_v3  ;;  %v1722_v37 = vand.u32 4294901760, %v212_v9  ;;  %v1727_v38 = vsub.f32 %v213_v62, %v1699_v8  ;;  %v388_v39 = vand.u32 4294901760, %v387_v14 }
  0x25   : > { %1141 = vmatpush3.msra.mxu1 %v353_v52  ;;  %1114 = vmatpush3.msra.mxu0 %v1591_v23  ;;  %v401_v40 = vsub.f32 %v1677_v60, %v400_v15  ;;  %v414_v41 = vand.u32 4294901760, %v1709_v27  ;;  %v395_v42 = vand.u32 4294901760, %v394_v32  ;;  %v408_v44 = vsub.f32 %v1692_v2, %v407_v33 }
  0x26   : > { %1142 = vmatprep.subr.mxu1 %v1448_v4  ;;  %1115 = vmatprep.subr.mxu0 %v1448_v4  ;;  %v421_v45 = vand.u32 4294901760, %v1719_v36  ;;  %v1741_v49 = vsub.f32 %v212_v9, %v1722_v37  ;;  %vm1449_vm0 = vmmov 0   ;;  %v428_v56 = vand.u32 4294901760, %v1727_v38 }
  0x27   : > { %1143 = vmatpush3.msra.mxu1 %v360_v58  ;;  %1116 = vmatpush3.msra.mxu0 %v1642_v46  ;;  %v402_v51 = vand.u32 4294901760, %v401_v40  ;;  %v415_v52 = vsub.f32 %v1709_v27, %v414_v41  ;;  %v409_v57 = vand.u32 4294901760, %v408_v44  ;;  %v209_v32 = vlaneseq }
  0x28   : > { %1144 = vmatprep.subr.mxu1 %v1448_v4  ;;  %1117 = vmatprep.subr.mxu0 %v1448_v4  ;;  %v422_v58 = vsub.f32 %v1719_v36, %v421_v45  ;;  %v435_v62 = vand.u32 4294901760, %v1741_v49  ;;  %v1450_v44 = vmov 1.0   ;;  %vm878_vm2 = vcmask 523264  }
  0x29   : > { %1145 = vmatpush3.msra.mxu1 %v367_v0  ;;  %1118 = vmatpush3.msra.mxu0 %v1645_v47  ;;  %v416_v63 = vand.u32 4294901760, %v415_v52  ;;  %v429_v0 = vsub.f32 %v1727_v38, %v428_v56 }
  0x2a   : > { %1146 = vmatprep.subr.mxu1 %v1448_v4  ;;  %1119 = vmatprep.subr.mxu0 %v1448_v4  ;;  %v423_v9 = vand.u32 4294901760, %v422_v58 }
  0x2b   : > { %1147 = vmatpush3.msra.mxu1 %v374_v10  ;;  %1120 = vmatpush3.msra.mxu0 %v1647_v48  ;;  %v436_v10 = vsub.f32 %v1741_v49, %v435_v62  ;;  %v430_v14 = vand.u32 4294901760, %v429_v0 }
  0x2c   : > { %1148 = vmatprep.subr.mxu1 %v1448_v4  ;;  %1121 = vmatprep.subr.mxu0 %v1448_v4 }
  0x2d   : > { %1149 = vmatpush3.msra.mxu1 %v381_v31  ;;  %1122 = vmatpush3.msra.mxu0 %v1665_v55  ;;  %v437_v31 = vand.u32 4294901760, %v436_v10 }
  0x2e   : > { %1150 = vmatprep.subr.mxu1 %v1448_v4  ;;  %1166 = vmatprep.mubr.msk.f32.mxu1 %vm1449_vm0, %v1448_v4 }
  0x2f   : > { %1151 = vmatpush3.msra.mxu1 %v388_v39  ;;  %1123 = vmatprep.subr.mxu0 %v1448_v4  ;;  %v1780_v39 = vand.u32 127, %v209_v32 }
  0x30   : > { %1152 = vmatprep.subr.mxu1 %v1448_v4  ;;  %1124 = vmatpush3.msra.mxu0 %v1680_v61 }
  0x31   : > { %1153 = vmatpush3.msra.mxu1 %v395_v42  ;;  %1125 = vmatprep.subr.mxu0 %v1448_v4 }
  0x32   : > { %1154 = vmatprep.subr.mxu1 %v1448_v4  ;;  %1126 = vmatpush3.msra.mxu0 %v1695_v3 }
  0x33   : > { %1155 = vmatpush3.msra.mxu1 %v402_v51  ;;  %1127 = vmatprep.subr.mxu0 %v1448_v4 }
  0x34   : > { %1156 = vmatprep.subr.mxu1 %v1448_v4  ;;  %1128 = vmatpush3.msra.mxu0 %v1699_v8 }
  0x35   : > { %1157 = vmatpush3.msra.mxu1 %v409_v57  ;;  %1129 = vmatprep.subr.mxu0 %v1448_v4 }
  0x36   : > { %1158 = vmatprep.subr.mxu1 %v1448_v4  ;;  %1130 = vmatpush3.msra.mxu0 %v1722_v37 }
  0x37   : > { %1159 = vmatpush3.msra.mxu1 %v416_v63  ;;  %1131 = vmatprep.mubr.msk.f32.mxu0 %vm1449_vm0, %v1448_v4 }
  0x38   : > { %1160 = vmatprep.subr.mxu1 %v1448_v4  ;;  %1169 = vmatprep.subr.mxu0 %v1448_v4 }
  0x39   : > { %1161 = vmatpush3.msra.mxu1 %v423_v9 }
  0x3a   : > { %1162 = vmatprep.subr.mxu1 %v1448_v4 }
  0x3b   : > { %1163 = vmatpush3.msra.mxu1 %v430_v14 }
  0x3c   : > { %1164 = vmatprep.subr.mxu1 %v1448_v4 }
  0x3d   : > { %1165 = vmatpush3.msra.mxu1 %v437_v31 }
  0x3e   : > { %1204 = vmatprep.subr.mxu1 %v1448_v4 }
  0x94   : > { %v1782_v40 = vpop.permute.xlu0 %231 }
  0x95   : > { %vm233_vm1 = vcmp.eq.s32.totalorder %v1782_v40, %v1780_v39 }
  0x96   : > { %v989_v42 = vsel %vm233_vm1, 1.0, %v1448_v4  ;;  %1167 = vmatmul.mubr.msk.f32.vlgmr.msra.gmra.mxu1 %vm233_vm1, %v1450_v44 }
  0x97   : > { %v1794_v51 = vsub.f32 %v989_v42, %v989_v42  ;;  %1205 = vmatpush3.msra.mxu1 %v1538_v5  ;;  %1236 = vmatprep.mubr.msk.f32.mxu1 %vm1449_vm0, %v1448_v4 }
  0x98   : > { %1206 = vmatprep.subr.mxu1 %v1448_v4 }
  0x99   : > { %1207 = vmatpush3.msra.mxu1 %v1540_v6  ;;  %v319_v52 = vand.u32 4294901760, %v1794_v51 }
  0x9a   : > { %1208 = vmatprep.subr.mxu1 %v1448_v4 }
  0x9b   : > { %1209 = vmatpush3.msra.mxu1 %v1542_v7  ;;  %v320_v57 = vsub.f32 %v1794_v51, %v319_v52 }
  0x9c   : > { %1210 = vmatprep.subr.mxu1 %v1448_v4 }
  0x9d   : > { %1211 = vmatpush3.msra.mxu1 %v1556_v11  ;;  %v321_v58 = vand.u32 4294901760, %v320_v57 }
  0x9e   : > { %1212 = vmatprep.subr.mxu1 %v1448_v4 }
  0x9f   : > { %1213 = vmatpush3.msra.mxu1 %v1559_v12  ;;  %1132 = vmatmul.mubr.f32.vlgmr.msra.gmra.mxu0 %v321_v58 }
  0xa0   : > { %1170 = vmatpush3.msra.mxu0 %v1570_v16  ;;  %1214 = vmatprep.subr.mxu1 %v1448_v4 }
  0xa1   : > { %1171 = vmatprep.subr.mxu0 %v1448_v4  ;;  %1215 = vmatpush3.msra.mxu1 %v1561_v13 }
  0xa2   : > { %1172 = vmatpush3.msra.mxu0 %v1573_v17  ;;  %1216 = vmatprep.subr.mxu1 %v1448_v4 }
  0xa3   : > { %1173 = vmatprep.subr.mxu0 %v1448_v4  ;;  %1217 = vmatpush3.msra.mxu1 %v1579_v19 }
  0xa4   : > { %1174 = vmatpush3.msra.mxu0 %v1576_v18  ;;  %1218 = vmatprep.subr.mxu1 %v1448_v4 }
  0xa5   : > { %1175 = vmatprep.subr.mxu0 %v1448_v4  ;;  %1219 = vmatpush3.msra.mxu1 %v1591_v23 }
  0xa6   : > { %1176 = vmatpush3.msra.mxu0 %v1582_v20  ;;  %1220 = vmatprep.subr.mxu1 %v1448_v4 }
  0xa7   : > { %1177 = vmatprep.subr.mxu0 %v1448_v4  ;;  %1221 = vmatpush3.msra.mxu1 %v1642_v46 }
  0xa8   : > { %1178 = vmatpush3.msra.mxu0 %v1585_v21  ;;  %1222 = vmatprep.subr.mxu1 %v1448_v4 }
  0xa9   : > { %1179 = vmatprep.subr.mxu0 %v1448_v4  ;;  %1223 = vmatpush3.msra.mxu1 %v1645_v47 }
  0xaa   : > { %1180 = vmatpush3.msra.mxu0 %v1589_v22  ;;  %1224 = vmatprep.subr.mxu1 %v1448_v4 }
  0xab   : > { %1181 = vmatprep.subr.mxu0 %v1448_v4  ;;  %1225 = vmatpush3.msra.mxu1 %v1647_v48 }
  0xac   : > { %1182 = vmatpush3.msra.mxu0 %v1604_v30  ;;  %1226 = vmatprep.subr.mxu1 %v1448_v4 }
  0xad   : > { %1183 = vmatprep.subr.mxu0 %v1448_v4  ;;  %1227 = vmatpush3.msra.mxu1 %v1665_v55 }
  0xae   : > { %1184 = vmatpush3.msra.mxu0 %v1619_v35  ;;  %1228 = vmatprep.subr.mxu1 %v1448_v4 }
  0xaf   : > { %1185 = vmatprep.subr.mxu0 %v1448_v4  ;;  %1229 = vmatpush3.msra.mxu1 %v1680_v61 }
  0xb0   : > { %1186 = vmatpush3.msra.mxu0 %v1659_v53  ;;  %1230 = vmatprep.subr.mxu1 %v1448_v4 }
  0xb1   : > { %1187 = vmatprep.subr.mxu0 %v1448_v4  ;;  %1231 = vmatpush3.msra.mxu1 %v1695_v3 }
  0xb2   : > { %1188 = vmatpush3.msra.mxu0 %v1662_v54  ;;  %1232 = vmatprep.subr.mxu1 %v1448_v4 }
  0xb3   : > { %1189 = vmatprep.subr.mxu0 %v1448_v4  ;;  %1233 = vmatpush3.msra.mxu1 %v1699_v8 }
  0xb4   : > { %1190 = vmatpush3.msra.mxu0 %v1677_v60  ;;  %1234 = vmatprep.subr.mxu1 %v1448_v4 }
  0xb5   : > { %1191 = vmatprep.subr.mxu0 %v1448_v4  ;;  %1235 = vmatpush3.msra.mxu1 %v1722_v37 }
  0xb6   : > { %1192 = vmatpush3.msra.mxu0 %v1692_v2  ;;  %1237 = vmatmul.mubr.f32.vlgmr.msra.gmra.mxu1 %v319_v52 }
  0xb7   : > { %1274 = vmatprep.subr.mxu1 %v1448_v4  ;;  %1193 = vmatprep.subr.mxu0 %v1448_v4 }
  0xb8   : > { %1275 = vmatpush3.msra.mxu1 %v1538_v5  ;;  %1194 = vmatpush3.msra.mxu0 %v1709_v27 }
  0xb9   : > { %1276 = vmatprep.subr.mxu1 %v1448_v4  ;;  %1195 = vmatprep.subr.mxu0 %v1448_v4 }
  0xba   : > { %1277 = vmatpush3.msra.mxu1 %v1540_v6  ;;  %1196 = vmatpush3.msra.mxu0 %v1719_v36 }
  0xbb   : > { %1278 = vmatprep.subr.mxu1 %v1448_v4  ;;  %1197 = vmatprep.subr.mxu0 %v1448_v4 }
  0xbc   : > { %1279 = vmatpush3.msra.mxu1 %v1542_v7  ;;  %1198 = vmatpush3.msra.mxu0 %v1727_v38 }
  0xbd   : > { %1280 = vmatprep.subr.mxu1 %v1448_v4  ;;  %1199 = vmatprep.subr.mxu0 %v1448_v4 }
  0xbe   : > { %1281 = vmatpush3.msra.mxu1 %v1556_v11  ;;  %1200 = vmatpush3.msra.mxu0 %v1741_v49 }
  0xbf   : > { %1201 = vmatprep.mubr.msk.f32.mxu0 %vm1449_vm0, %v1448_v4  ;;  %1282 = vmatprep.subr.mxu1 %v1448_v4 }
  0xc0   : > { %1202 = vmatmul.mubr.f32.vlgmr.msra.gmra.mxu0 %v1794_v51  ;;  %1239 = vmatprep.subr.mxu0 %v1448_v4 }
  0xc1   : > { %1283 = vmatpush3.msra.mxu1 %v1559_v12  ;;  %1240 = vmatpush3.msra.mxu0 %v330_v24  ;;  %v211_v24 = vld [vmem:[%s2001_s2] sm:$0xff] }
  0xc2   : > { %1284 = vmatprep.subr.mxu1 %v1448_v4  ;;  %1241 = vmatprep.subr.mxu0 %v1448_v4 }
  0xc3   : > { %1285 = vmatpush3.msra.mxu1 %v1561_v13  ;;  %1242 = vmatpush3.msra.mxu0 %v337_v25 }
  0xc4   : > { %1286 = vmatprep.subr.mxu1 %v1448_v4  ;;  %1243 = vmatprep.subr.mxu0 %v1448_v4 }
  0xc5   : > { %1287 = vmatpush3.msra.mxu1 %v1579_v19  ;;  %1244 = vmatpush3.msra.mxu0 %v344_v26 }
  0xc6   : > { %1288 = vmatprep.subr.mxu1 %v1448_v4  ;;  %1245 = vmatprep.subr.mxu0 %v1448_v4 }
  0xc7   : > { %1289 = vmatpush3.msra.mxu1 %v1591_v23  ;;  %1246 = vmatpush3.msra.mxu0 %v351_v28 }
  0xc8   : > { %1290 = vmatprep.subr.mxu1 %v1448_v4  ;;  %1247 = vmatprep.subr.mxu0 %v1448_v4 }
  0xc9   : > { %1291 = vmatpush3.msra.mxu1 %v1642_v46  ;;  %1248 = vmatpush3.msra.mxu0 %v358_v29 }
  0xca   : > { %1292 = vmatprep.subr.mxu1 %v1448_v4  ;;  %1249 = vmatprep.subr.mxu0 %v1448_v4 }
  0xcb   : > { %1293 = vmatpush3.msra.mxu1 %v1645_v47  ;;  %1250 = vmatpush3.msra.mxu0 %v365_v34 }
  0xcc   : > { %1294 = vmatprep.subr.mxu1 %v1448_v4  ;;  %1251 = vmatprep.subr.mxu0 %v1448_v4 }
  0xcd   : > { %1295 = vmatpush3.msra.mxu1 %v1647_v48  ;;  %1252 = vmatpush3.msra.mxu0 %v372_v43 }
  0xce   : > { %1296 = vmatprep.subr.mxu1 %v1448_v4  ;;  %1253 = vmatprep.subr.mxu0 %v1448_v4 }
  0xcf   : > { %1297 = vmatpush3.msra.mxu1 %v1665_v55  ;;  %1254 = vmatpush3.msra.mxu0 %v379_v50 }
  0xd0   : > { %1298 = vmatprep.subr.mxu1 %v1448_v4  ;;  %1255 = vmatprep.subr.mxu0 %v1448_v4 }
  0xd1   : > { %1299 = vmatpush3.msra.mxu1 %v1680_v61  ;;  %1256 = vmatpush3.msra.mxu0 %v386_v59 }
  0xd2   : > { %1300 = vmatprep.subr.mxu1 %v1448_v4  ;;  %1257 = vmatprep.subr.mxu0 %v1448_v4 }
  0xd3   : > { %1301 = vmatpush3.msra.mxu1 %v1695_v3  ;;  %1258 = vmatpush3.msra.mxu0 %v393_v1 }
  0xd4   : > { %1302 = vmatprep.subr.mxu1 %v1448_v4  ;;  %1259 = vmatprep.subr.mxu0 %v1448_v4 }
  0xd5   : > { %1303 = vmatpush3.msra.mxu1 %v1699_v8  ;;  %1260 = vmatpush3.msra.mxu0 %v400_v15 }
  0xd6   : > { %1304 = vmatprep.subr.mxu1 %v1448_v4  ;;  %1261 = vmatprep.subr.mxu0 %v1448_v4 }
  0xd7   : > { %1305 = vmatpush3.msra.mxu1 %v1722_v37  ;;  %1306 = vmatprep.mubr.msk.f32.mxu1 %vm1449_vm0, %v1448_v4 }
  0xd8   : > { %1262 = vmatpush3.msra.mxu0 %v407_v33  ;;  %1307 = vmatmul.mubr.msk.f32.vlgmr.msra.gmra.mxu1 %vm233_vm1, %v1450_v44 }
  0xd9   : > { %1263 = vmatprep.subr.mxu0 %v1448_v4  ;;  %1271 = vmatprep.mubr.msk.f32.mxu0 %vm1449_vm0, %v1448_v4 }
  0xda   : > { %1264 = vmatpush3.msra.mxu0 %v414_v41 }
  0xdb   : > { %1265 = vmatprep.subr.mxu0 %v1448_v4 }
  0xdc   : > { %1266 = vmatpush3.msra.mxu0 %v421_v45 }
  0xdd   : > { %1267 = vmatprep.subr.mxu0 %v1448_v4 }
  0xde   : > { %1268 = vmatpush3.msra.mxu0 %v428_v56 }
  0xdf   : > { %1269 = vmatprep.subr.mxu0 %v1448_v4 }
  0xe0   : > { %1270 = vmatpush3.msra.mxu0 %v435_v62 }
  0xe1   : > { %1272 = vmatmul.mubr.msk.f32.vlgmr.msra.gmra.mxu0 %vm233_vm1, %v1450_v44 }
 0x156   : > { %v474_v5 = vpop.f32.mrf.mxu1 }
 0x158   : > { %v1168_v6 = vpop.f32.mrf.mxu1 }
 0x15f   : > { %v323_v7 = vpop.f32.mrf.mxu0 }
 0x160   : > { %v475_v19 = vadd.f32 %v474_v5, %v323_v7 }
 0x161   : > { %v1133_v11 = vpop.f32.mrf.mxu0 }
 0x176   : > { %v667_v12 = vpop.f32.mrf.mxu1 }
 0x178   : > { %v1238_v13 = vpop.f32.mrf.mxu1 }
 0x180   : > { %v578_v16 = vpop.f32.mrf.mxu0 }
 0x181   : > { %v579_v20 = vadd.f32 %v578_v16, %v475_v19 }
 0x182   : > { %v1203_v17 = vpop.f32.mrf.mxu0 }
 0x183   : > { %v668_v21 = vadd.f32 %v667_v12, %v579_v20 }
 0x198   : > { %v873_v18 = vpop.f32.mrf.mxu1 }
 0x19a   : > { %v1308_v4 = vpop.f32.mrf.mxu1 }
 0x1a1   : > { %v786_v22 = vpop.f32.mrf.mxu0 }
 0x1a2   : > { %v787_v23 = vadd.f32 %v786_v22, %v668_v21 }
 0x1a3   : > { %v1273_v25 = vpop.f32.mrf.mxu0 }
 0x1a4   : > { %v874_v26 = vadd.f32 %v873_v18, %v787_v23 }
 0x1a6   : > { %v877_v28 = vadd.f32 %v874_v26, %v211_v24 }
 0x1a8   : > { %879 = vst.msk [vmem:[%s196_s7] sm:$0xff] %vm878_vm2, %v877_v28 }
 0x1a9   : > { %1382 = shalt.err (!%p1379_p5)
}
 0x1aa   : > { %s1383_s26 = scalar_lea.hbm %s893_s11, 128  ;;  %s1387_s29 = scalar_lea.hbm %s2002_s3, 256 }
 0x1ab   : > { %p1384_p6 = scmp.ne.s32.totalorder %s893_s11, %s1383_s26  ;;  %p1388_p10 = scmp.lt.s32.totalorder %s893_s11, %s2002_s3 }
 0x1ac   : > { %p1389_p11 = scmp.lt.s32.totalorder %s1387_s29, %s1383_s26 }
 0x1ad   : > { %p1385_p7 = pnand %p1384_p6, %p1512_p4 }
 0x1ae   : > { %p1390_p12 = por %p1389_p11, %p1388_p10 }
 0x1af   : > { %p1386_p9 = pneg %p1385_p7 }
 0x1b1   : > { %p1391_p13 = pnand %p1390_p12, %p1386_p9 }
 0x1b3   : > { %1394 = shalt.err (!%p1391_p13)
}
 0x1b4   : > { %1309 = dma.vmem_to_hbm [thread:$0]  (%p1512_p4), %s896_s8, 128, %s893_s11, %s881_s18  }
 0x1b5 PF: > { %p1315_p0 = scmp.ge.s32.totalorder %s1445_s17, 2  ;;  %s907_s5 = sand.u32 1, %s1425_s12  }
 0x1b6   : > { %s908_s6 = scalar_lea.sflag [#allocation3], %s907_s5 }
 0x1b7   : > { %p1312_p1 = pnand %p1315_p0, %p1519_p8 }
 0x1b9   : > { %p1313_p2 = pneg %p1312_p1 }
 0x1bb   : > { %1420 = dma.done.wait (%p1313_p2), %s908_s6, 128  }
 0x1bc   : > { %1422 = vsyncadd (%p1313_p2), %s908_s6, 4294967168  ;;  %s16_s17 = sadd.s32 1, %s1445_s17   ;;  %s2005_s12 = smov %s1429_s13 }
 0x1bd   : > { %p13_p3 = scmp.ge.s32.totalorder %s16_s17, 4   ;;  %s2006_s13 = smov %s1433_s14 }
 0x1be   : > { %s2007_s14 = smov %s1525_s25  ;;  %s2008_s15 = smov %s1441_s16 }
 0x1bf   : > { %s2009_s16 = smov %s2011_s20  ;;  %15 = sbr.rel (!%p13_p3) target bundleno = 4 (0x4), region = 70 }
 0x1c4   :  { %913 = vsyncpa [#allocation3], 1 }
 0x1c5   :  { %915 = vsyncpa [#allocation3 + $0x1], 1 }

</bundles_post_ra>
